<compile_context>
chip_gen: v7x
topology: tpu7x:2x2x1
jax: 0.10.0
libtpu: 0.0.40
codegen_flags: <defaults>
</compile_context>

<pallas_src>
import functools

import jax
import jax.numpy as jnp
from jax.experimental import pallas as pl
from jax.experimental.pallas import tpu as pltpu

EPS = 1e-5


# ----------------------------- fused forward kernel -----------------------------
def _fused_densenet_kernel(pw_ref, w1_ref, c_ref, w2_ref, o_ref, *, hw):
    """One grid step = one whole image.

    pw_ref : (1, 9*hw, 49) bf16  im2col patches, tap-major (9 pool taps x Hp*Wp pos)
    w1_ref : (49, 64)      bf16  conv weight (im2col layout), BN1 scale pre-folded
    c_ref  : (8, 128)      f32   packed constants:
                                   row 0, lanes 0:64  -> t1 (conv bias + BN1 shift)
                                   row 1, lanes 0:64  -> s2 (BN2 scale)
                                   row 2, lanes 0:64  -> t2 (BN2 shift)
                                   row 3, lanes 0:128 -> fc bias (zero-padded)
    w2_ref : (64, 128)     f32   Linear weight * 1/(Hp*Wp), zero-padded 10 -> 128
    o_ref  : (1, 1, 128)   f32   padded logits of this image
    """
    # Conv2d(1, 64, 7, s=2, p=3) for all 9 pool taps at once, BN1 folded -> +t1, ReLU.
    conv = jnp.dot(pw_ref[0], w1_ref[...],
                   preferred_element_type=jnp.float32)               # (9*hw, 64)
    conv = jnp.maximum(conv + c_ref[0:1, :64], 0.0)

    # MaxPool2d(3, stride=2, padding=1): pairwise tree max over the 9 contiguous
    # (hw, 64) tap chunks (static slices, no strided/gather ops).
    taps = [conv[t * hw:(t + 1) * hw, :] for t in range(9)]
    while len(taps) > 1:
        nxt = [jnp.maximum(taps[i], taps[i + 1])
               for i in range(0, len(taps) - 1, 2)]
        if len(taps) % 2:
            nxt.append(taps[-1])
        taps = nxt
    pooled = taps[0]                                                  # (hw, 64)

    # BatchNorm2 + ReLU.
    y = jnp.maximum(pooled * c_ref[1:2, :64] + c_ref[2:3, :64], 0.0)

    # AdaptiveAvgPool2d((1,1)) (1/area folded into w2) + Linear(64 -> 10), 128 lanes.
    s = jnp.sum(y, axis=0, keepdims=True)                             # (1, 64)
    o_ref[0] = (jnp.dot(s, w2_ref[...],
                        preferred_element_type=jnp.float32) + c_ref[3:4, :])


# ----------------------------------- wrapper -------------------------------------
def densenet_forward(x, params):
    """x: (N, 1, H, W) float32 (NCHW, like PyTorch). Returns (N, 10) float32."""
    (conv_w, conv_b, g1, b1, m1, v1, g2, b2bn, m2, v2, fc_w, fc_b) = params
    N, Cin, H, W = x.shape
    assert Cin == 1

    Ho = (H + 6 - 7) // 2 + 1               # conv output size (floor mode)
    Wo = (W + 6 - 7) // 2 + 1
    Hp = (Ho + 2 - 3) // 2 + 1              # maxpool output size (floor mode)
    Wp = (Wo + 2 - 3) // 2 + 1
    hw = Hp * Wp

    # ---- im2col on the tiny 1-channel input (cheap XLA glue) ----
    xp = jnp.pad(x[:, 0], ((0, 0), (3, 3), (3, 3)))                  # (N, H+6, W+6)
    cols = []
    for ky in range(7):
        for kx in range(7):
            cols.append(xp[:, ky:ky + 2 * (Ho - 1) + 1:2,
                            kx:kx + 2 * (Wo - 1) + 1:2])
    patches = jnp.stack(cols, axis=-1)                               # (N, Ho, Wo, 49)

    # ---- tap-outermost maxpool-window layout: (N, 9*Hp*Wp, 49) ----
    # Tap (dy, dx) of pooled position (py, px) reads conv position
    # (2*py + dy - 1, 2*px + dx - 1).  Edge-padding + strided slices implement the
    # index clamp; a clamped tap is always another member of the same window, so the
    # window max is identical to MaxPool2d's -inf padding.
    pad_h = max(0, 2 * Hp - Ho)
    pad_w = max(0, 2 * Wp - Wo)
    pe = jnp.pad(patches, ((0, 0), (1, pad_h), (1, pad_w), (0, 0)), mode="edge")
    taps = []
    for dy in range(3):
        for dx in range(3):
            taps.append(pe[:, dy:dy + 2 * Hp:2, dx:dx + 2 * Wp:2, :])  # (N,Hp,Wp,49)
    pwin = jnp.stack(taps, axis=1).reshape(N, 9 * hw, 49).astype(jnp.bfloat16)

    # ---- fold parameters (all folds in f32, single cast to bf16 for the weight) ----
    s1 = g1 / jnp.sqrt(v1 + EPS)
    w1 = (conv_w.reshape(64, 49).T * s1[None, :]).astype(jnp.bfloat16)   # (49, 64)
    t1 = (conv_b - m1) * s1 + b1
    s2 = g2 / jnp.sqrt(v2 + EPS)
    t2 = b2bn - m2 * s2
    inv_area = 1.0 / float(hw)
    w2 = jnp.zeros((64, 128), jnp.float32).at[:, :10].set(fc_w.T * inv_area)

    consts = jnp.zeros((8, 128), jnp.float32)
    consts = consts.at[0, :64].set(t1)
    consts = consts.at[1, :64].set(s2)
    consts = consts.at[2, :64].set(t2)
    consts = consts.at[3, :10].set(fc_b)

    kernel = functools.partial(_fused_densenet_kernel, hw=hw)

    out = pl.pallas_call(
        kernel,
        out_shape=jax.ShapeDtypeStruct((N, 1, 128), jnp.float32),
        grid_spec=pltpu.PrefetchScalarGridSpec(
            num_scalar_prefetch=0,
            grid=(N,),
            in_specs=[
                pl.BlockSpec((1, 9 * hw, 49), lambda n: (n, 0, 0)),
                pl.BlockSpec((49, 64), lambda n: (0, 0)),
                pl.BlockSpec((8, 128), lambda n: (0, 0)),
                pl.BlockSpec((64, 128), lambda n: (0, 0)),
            ],
            out_specs=pl.BlockSpec((1, 1, 128), lambda n: (n, 0, 0)),
        ),
        compiler_params=pltpu.CompilerParams(
            dimension_semantics=("parallel",)),
    )(pwin, w1, consts, w2)

    return out[:, 0, :10]


# ----------------------------- pure-JAX reference --------------------------------
def densenet_reference(x, params):
    (conv_w, conv_b, g1, b1, m1, v1, g2, b2bn, m2, v2, fc_w, fc_b) = params
    y = jax.lax.conv_general_dilated(
        x, conv_w, window_strides=(2, 2), padding=((3, 3), (3, 3)),
        dimension_numbers=("NCHW", "OIHW", "NCHW")) + conv_b[None, :, None, None]
    y = (y - m1[None, :, None, None]) / jnp.sqrt(v1[None, :, None, None] + EPS)
    y = y * g1[None, :, None, None] + b1[None, :, None, None]
    y = jnp.maximum(y, 0.0)
    y = jnp.pad(y, ((0, 0), (0, 0), (1, 1), (1, 1)), constant_values=-jnp.inf)
    y = jax.lax.reduce_window(y, -jnp.inf, jax.lax.max,
                              (1, 1, 3, 3), (1, 1, 2, 2), "VALID")
    y = (y - m2[None, :, None, None]) / jnp.sqrt(v2[None, :, None, None] + EPS)
    y = y * g2[None, :, None, None] + b2bn[None, :, None, None]
    y = jnp.maximum(y, 0.0)
    pooled = jnp.mean(y, axis=(2, 3))
    return pooled @ fc_w.T + fc_b[None, :]


def init_params(key):
    k_conv, k_fc = jax.random.split(key, 2)
    conv_w = 0.1 * jax.random.normal(k_conv, (64, 1, 7, 7), dtype=jnp.float32)
    conv_b = jnp.zeros((64,), jnp.float32)
    # BatchNorm2d(64) #1 (after conv): gamma, beta, running_mean, running_var
    g1, b1 = jnp.ones((64,), jnp.float32), jnp.zeros((64,), jnp.float32)
    m1, v1 = jnp.zeros((64,), jnp.float32), jnp.ones((64,), jnp.float32)
    # BatchNorm2d(64) #2 (head)
    g2, b2 = jnp.ones((64,), jnp.float32), jnp.zeros((64,), jnp.float32)
    m2, v2 = jnp.zeros((64,), jnp.float32), jnp.ones((64,), jnp.float32)
    # Linear(64, 10)
    fc_w = 0.1 * jax.random.normal(k_fc, (10, 64), dtype=jnp.float32)
    fc_b = jnp.zeros((10,), jnp.float32)
    return (conv_w, conv_b, g1, b1, m1, v1, g2, b2, m2, v2, fc_w, fc_b)


if __name__ == "__main__":
    key = jax.random.PRNGKey(0)
    k_x, k_p = jax.random.split(key)
    x = jax.random.normal(k_x, (2, 1, 16, 16), dtype=jnp.float32)   # NCHW, 1 channel
    params = init_params(k_p)

    out = jax.jit(densenet_forward)(x, params)
    out = jax.block_until_ready(out)
    assert out.shape == (2, 10) and out.dtype == jnp.float32

    ref = densenet_reference(x, params)
    err = float(jnp.max(jnp.abs(out - ref)))
    assert err < 5e-2, f"kernel/reference mismatch: max abs err = {err}"

    print("KERNEL_OK")
</pallas_src>

<mosaic_0001>
module attributes {stable_mosaic.version = 11 : i64} {
  func.func @_fused_densenet_kernel(%arg0: i32, %arg1: memref<1x144x49xbf16, #tpu.memory_space<vmem>>, %arg2: memref<49x64xbf16, #tpu.memory_space<vmem>>, %arg3: memref<8x128xf32, #tpu.memory_space<vmem>>, %arg4: memref<64x128xf32, #tpu.memory_space<vmem>>, %arg5: memref<1x1x128xf32, #tpu.memory_space<vmem>>) attributes {dimension_semantics = [#tpu.dimension_semantics<parallel>], iteration_bounds = array<i64: 2>, scalar_prefetch = 0 : i64, scratch_operands = 0 : i64, tpu.core_type = #tpu.core_type<tc>, window_params = [{transform_indices = @transform_0, window_bounds = array<i64: 1, 144, 49>}, {pipeline_mode = #tpu.pipeline_mode<synchronous>, transform_indices = @transform_1, window_bounds = array<i64: 49, 64>}, {pipeline_mode = #tpu.pipeline_mode<synchronous>, transform_indices = @transform_2, window_bounds = array<i64: 8, 128>}, {pipeline_mode = #tpu.pipeline_mode<synchronous>, transform_indices = @transform_3, window_bounds = array<i64: 64, 128>}, {transform_indices = @transform_4, window_bounds = array<i64: 1, 1, 128>}]} {
    %c0 = arith.constant 0 : index
    %c0_0 = arith.constant 0 : index
    %c0_1 = arith.constant 0 : index
    %0 = vector.load %arg1[%c0, %c0_0, %c0_1] : memref<1x144x49xbf16, #tpu.memory_space<vmem>>, vector<1x144x49xbf16>
    %1 = vector.shape_cast %0 : vector<1x144x49xbf16> to vector<144x49xbf16>
    %c0_2 = arith.constant 0 : index
    %c0_3 = arith.constant 0 : index
    %2 = vector.load %arg2[%c0_2, %c0_3] : memref<49x64xbf16, #tpu.memory_space<vmem>>, vector<49x64xbf16>
    %cst = arith.constant dense<0.000000e+00> : vector<144x64xf32>
    %3 = tpu.matmul %1, %2, %cst {dimension_numbers = #tpu.dot_dimension_numbers<[1], [0], [0], [1], [0, 0, 1, 1], [], []>} : vector<144x49xbf16>, vector<49x64xbf16>, vector<144x64xf32> -> vector<144x64xf32>
    %c0_4 = arith.constant 0 : index
    %c0_5 = arith.constant 0 : index
    %4 = vector.load %arg3[%c0_4, %c0_5] : memref<8x128xf32, #tpu.memory_space<vmem>>, vector<1x64xf32>
    %5 = vector.broadcast %4 : vector<1x64xf32> to vector<144x64xf32>
    %6 = arith.addf %3, %5 : vector<144x64xf32>
    %cst_6 = arith.constant 0.000000e+00 : f32
    %7 = vector.broadcast %cst_6 : f32 to vector<144x64xf32>
    %8 = arith.maximumf %6, %7 : vector<144x64xf32>
    %9 = vector.extract_strided_slice %8 {offsets = [0, 0], sizes = [16, 64], strides = [1, 1]} : vector<144x64xf32> to vector<16x64xf32>
    %10 = vector.extract_strided_slice %8 {offsets = [16, 0], sizes = [16, 64], strides = [1, 1]} : vector<144x64xf32> to vector<16x64xf32>
    %11 = vector.extract_strided_slice %8 {offsets = [32, 0], sizes = [16, 64], strides = [1, 1]} : vector<144x64xf32> to vector<16x64xf32>
    %12 = vector.extract_strided_slice %8 {offsets = [48, 0], sizes = [16, 64], strides = [1, 1]} : vector<144x64xf32> to vector<16x64xf32>
    %13 = vector.extract_strided_slice %8 {offsets = [64, 0], sizes = [16, 64], strides = [1, 1]} : vector<144x64xf32> to vector<16x64xf32>
    %14 = vector.extract_strided_slice %8 {offsets = [80, 0], sizes = [16, 64], strides = [1, 1]} : vector<144x64xf32> to vector<16x64xf32>
    %15 = vector.extract_strided_slice %8 {offsets = [96, 0], sizes = [16, 64], strides = [1, 1]} : vector<144x64xf32> to vector<16x64xf32>
    %16 = vector.extract_strided_slice %8 {offsets = [112, 0], sizes = [16, 64], strides = [1, 1]} : vector<144x64xf32> to vector<16x64xf32>
    %17 = vector.extract_strided_slice %8 {offsets = [128, 0], sizes = [16, 64], strides = [1, 1]} : vector<144x64xf32> to vector<16x64xf32>
    %18 = arith.maximumf %9, %10 : vector<16x64xf32>
    %19 = arith.maximumf %11, %12 : vector<16x64xf32>
    %20 = arith.maximumf %13, %14 : vector<16x64xf32>
    %21 = arith.maximumf %15, %16 : vector<16x64xf32>
    %22 = arith.maximumf %18, %19 : vector<16x64xf32>
    %23 = arith.maximumf %20, %21 : vector<16x64xf32>
    %24 = arith.maximumf %22, %23 : vector<16x64xf32>
    %25 = arith.maximumf %24, %17 : vector<16x64xf32>
    %c1 = arith.constant 1 : index
    %c0_7 = arith.constant 0 : index
    %26 = vector.load %arg3[%c1, %c0_7] : memref<8x128xf32, #tpu.memory_space<vmem>>, vector<1x64xf32>
    %27 = vector.broadcast %26 : vector<1x64xf32> to vector<16x64xf32>
    %28 = arith.mulf %25, %27 : vector<16x64xf32>
    %c2 = arith.constant 2 : index
    %c0_8 = arith.constant 0 : index
    %29 = vector.load %arg3[%c2, %c0_8] : memref<8x128xf32, #tpu.memory_space<vmem>>, vector<1x64xf32>
    %30 = vector.broadcast %29 : vector<1x64xf32> to vector<16x64xf32>
    %31 = arith.addf %28, %30 : vector<16x64xf32>
    %cst_9 = arith.constant 0.000000e+00 : f32
    %32 = vector.broadcast %cst_9 : f32 to vector<16x64xf32>
    %33 = arith.maximumf %31, %32 : vector<16x64xf32>
    %cst_10 = arith.constant dense<0.000000e+00> : vector<64xf32>
    %34 = vector.multi_reduction <add>, %33, %cst_10 [0] : vector<16x64xf32> to vector<64xf32>
    %35 = vector.shape_cast %34 : vector<64xf32> to vector<1x64xf32>
    %c0_11 = arith.constant 0 : index
    %c0_12 = arith.constant 0 : index
    %36 = vector.load %arg4[%c0_11, %c0_12] : memref<64x128xf32, #tpu.memory_space<vmem>>, vector<64x128xf32>
    %cst_13 = arith.constant dense<0.000000e+00> : vector<1x128xf32>
    %37 = tpu.matmul %35, %36, %cst_13 {dimension_numbers = #tpu.dot_dimension_numbers<[1], [0], [0], [1], [0, 0, 1, 1], [], []>} : vector<1x64xf32>, vector<64x128xf32>, vector<1x128xf32> -> vector<1x128xf32>
    %c3 = arith.constant 3 : index
    %c0_14 = arith.constant 0 : index
    %38 = vector.load %arg3[%c3, %c0_14] : memref<8x128xf32, #tpu.memory_space<vmem>>, vector<1x128xf32>
    %39 = arith.addf %37, %38 : vector<1x128xf32>
    %c0_15 = arith.constant 0 : index
    %c0_16 = arith.constant 0 : index
    %c0_17 = arith.constant 0 : index
    %40 = vector.load %arg5[%c0_15, %c0_16, %c0_17] : memref<1x1x128xf32, #tpu.memory_space<vmem>>, vector<1x1x128xf32>
    %41 = vector.shape_cast %40 : vector<1x1x128xf32> to vector<1x128xf32>
    %42 = vector.shape_cast %39 : vector<1x128xf32> to vector<1x1x128xf32>
    tpu.vector_store %arg5[%c0_15, %c0_16, %c0_17], %42 {strides = array<i32>} : memref<1x1x128xf32, #tpu.memory_space<vmem>>, vector<1x1x128xf32>,
    return
  }
  func.func @transform_0(%arg0: i32) -> (i32, i32, i32) {
    %c0_i32 = arith.constant 0 : i32
    %c0_i32_0 = arith.constant 0 : i32
    %c0_i32_1 = arith.constant 0 : i32
    return %arg0, %c0_i32, %c0_i32_0 : i32, i32, i32
  }
  func.func @transform_1(%arg0: i32) -> (i32, i32) {
    %c0_i32 = arith.constant 0 : i32
    %c0_i32_0 = arith.constant 0 : i32
    %c0_i32_1 = arith.constant 0 : i32
    return %c0_i32, %c0_i32_0 : i32, i32
  }
  func.func @transform_2(%arg0: i32) -> (i32, i32) {
    %c0_i32 = arith.constant 0 : i32
    %c0_i32_0 = arith.constant 0 : i32
    %c0_i32_1 = arith.constant 0 : i32
    return %c0_i32, %c0_i32_0 : i32, i32
  }
  func.func @transform_3(%arg0: i32) -> (i32, i32) {
    %c0_i32 = arith.constant 0 : i32
    %c0_i32_0 = arith.constant 0 : i32
    %c0_i32_1 = arith.constant 0 : i32
    return %c0_i32, %c0_i32_0 : i32, i32
  }
  func.func @transform_4(%arg0: i32) -> (i32, i32, i32) {
    %c0_i32 = arith.constant 0 : i32
    %c0_i32_0 = arith.constant 0 : i32
    %c0_i32_1 = arith.constant 0 : i32
    return %arg0, %c0_i32, %c0_i32_0 : i32, i32, i32
  }
}

</mosaic_0001>

<bundles_post_ra>
// kernel: densenet_forward.1
= control target key start
LH: loop header
LB: loop body
LE: loop exit
PB: predicated region body
PF: predicated region fallthrough
CT: control target
= control target key end

     0   :  { %9 = vsyncpa [#allocation3], 0  ;;  %s1119_s0 = inlined_call_operand.vmem [shape: bf16[2,144,49], index: 0, kind: input, shape index: {}]   ;;  %s1120_s1 = inlined_call_operand.vmem [shape: bf16[49,64], index: 1, kind: input, shape index: {}]   ;;  %s1121_s2 = inlined_call_operand.vmem [shape: f32[8,128], index: 2, kind: input, shape index: {}]   ;;  %s1122_s3 = inlined_call_operand.vmem [shape: f32[64,128], index: 3, kind: input, shape index: {}]   ;;  %s1123_s4 = inlined_call_operand.hbm [shape: f32[2,1,128], index: 4, kind: output, shape index: {}]  }
   0x1   :  { %11 = vsyncpa [#allocation3 + $0x1], 0  ;;  %s932_s15 = smov 0   ;;  %s934_s16 = smov 0  }
   0x2   :  { %s936_s17 = smov 0   ;;  %s938_s18 = smov 0  }
   0x3 LB: > { %s953_s19 = sadd.s32 4294967295, %s900_s18   ;;  %s642_s20 = sadd.s32 4294967294, %s900_s18   ;;  %s900_s18 = sphi %s938_s18, %s1129_s18   ;;  %s896_s17 = sphi %s936_s17, %s1128_s17   ;;  %s892_s16 = sphi %s934_s16, %s1127_s16   ;;  %s888_s15 = sphi %s932_s15, %s1126_s15  }
   0x4   : > { %s957_s21 = sadd.s32 1, %s900_s18   ;;  %s113_s22 = sadd.s32 1, %s896_s17 }
   0x5   : > { %s110_s23 = ssub.s32 %s900_s18, %s957_s21  ;;  %p123_p0 = scmp.ne.s32.totalorder %s896_s17, %s892_s16 }
   0x6   : > { %p111_p1 = scmp.eq.s32.totalorder %s110_s23, 0  ;;  %p124_p2 = scmp.eq.s32.totalorder %s953_s19, 1 }
   0x7   : > { %p129_p3 = scmp.ne.s32.totalorder %s892_s16, %s888_s15  ;;  %p130_p4 = scmp.eq.s32.totalorder %s642_s20, 1 }
   0x8   : > { %s968_s24 = scalar_select %p111_p1, %s896_s17, %s113_s22  }
   0x9   : > { %p970_p5 = por %p124_p2, %p123_p0  ;;  %p974_p6 = por %p130_p4, %p129_p3 }
   0xa   : > { %p645_p7 = scmp.ge.s32.totalorder %s900_s18, 1  ;;  %p165_p8 = scmp.lt.s32.totalorder %s900_s18, 3 }
   0xc   : > { %p166_p9 = pnand %p645_p7, %p165_p8 }
   0xd   : > { %v825_v0 = vld [vmem:[%s1120_s1] sm:$0xff] (!%p166_p9)   ;;  %v902_v1 = vmov (!%p166_p9), 0.0   ;;  %v826_v2 = vld [vmem:[%s1120_s1 + $0x8] sm:$0xff] (!%p166_p9)   ;;  %vm320_vm0 = vcmask (!%p166_p9), 1040384   ;;  %p190_p10 = scmp.lt.s32.totalorder (!%p166_p9), %s953_s19, 1  ;;  %vm903_vm1 = vmmov (!%p166_p9), 0  }
   0xe   : > { %169 = sbr.rel (%p166_p9) target bundleno = 537 (0x219), region = 36  ;;  %698 = vmatprep.subr.bf16.mxu0 (!%p166_p9), %v902_v1  ;;  %773 = vmatprep.subr.bf16.mxu1 (!%p166_p9), %v902_v1  ;;  %v827_v3 = vld [vmem:[%s1120_s1 + $0x10] sm:$0xff] (!%p166_p9)   ;;  %v828_v4 = vld [vmem:[%s1120_s1 + $0x18] ss:$0 sps:$4 sm:$0x11] (!%p166_p9)   ;;  %v904_v5 = vmov (!%p166_p9), 0  }
   0xf   : > { %699 = vmatpush3.bf16.msra.mxu0 (!%p166_p9), %v825_v0  ;;  %777 = vmatpush3.bf16.msra.mxu1 (!%p166_p9), %v825_v0  ;;  %v322_v6 = vsel (!%p166_p9), %vm320_vm0, 65535, %v904_v5  ;;  %vm292_vm2 = vcmask (!%p166_p9), 400384   ;;  %v491_v17 = vld [vmem:[%s1122_s3] sm:$0xff] (!%p166_p9)  ;;  %v492_v18 = vld [vmem:[%s1122_s3 + $0x8] sm:$0xff] (!%p166_p9)  ;;  %v905_v19 = vmov (!%p166_p9), 0.0|0.0   ;;  %v493_v21 = vld [vmem:[%s1122_s3 + $0x10] sm:$0xff] (!%p166_p9) }
  0x10   : > { %700 = vmatprep.subr.bf16.mxu0 (!%p166_p9), %v902_v1  ;;  %774 = vmatprep.subr.bf16.mxu1 (!%p166_p9), %v902_v1  ;;  %v324_v7 = vand.u32 (!%p166_p9), %v828_v4, %v322_v6  ;;  %v762_v20 = vpack.c.bf16 (!%p166_p9), %v492_v18, %v491_v17  ;;  %v494_v22 = vld [vmem:[%s1122_s3 + $0x18] sm:$0xff] (!%p166_p9)  ;;  %v495_v24 = vld [vmem:[%s1122_s3 + $0x20] sm:$0xff] (!%p166_p9)  ;;  %v496_v25 = vld [vmem:[%s1122_s3 + $0x28] sm:$0xff] (!%p166_p9)  ;;  %vm481_vm3 = vcmask (!%p166_p9), 523264   ;;  %s188_s28 = sand.u32 (!%p166_p9), 1, %s892_s16   ;;  %s673_s5 = sshll.u32 (!%p166_p9), %s953_s19, 4 }
  0x11   : > { %706 = vmatprep.mubr.msk.bf16.mxu0 (!%p166_p9), %vm903_vm1, %v902_v1  ;;  %726 = vmatprep.mubr.msk.bf16.mxu1 (!%p166_p9), %vm903_vm1, %v902_v1  ;;  %v765_v23 = vpack.c.bf16 (!%p166_p9), %v494_v22, %v493_v21  ;;  %v768_v26 = vpack.c.bf16 (!%p166_p9), %v496_v25, %v495_v24  ;;  %v497_v27 = vld [vmem:[%s1122_s3 + $0x30] sm:$0xff] (!%p166_p9)  ;;  %v498_v28 = vld [vmem:[%s1122_s3 + $0x38] sm:$0xff] (!%p166_p9)  ;;  %v1043_v38 = vld [vmem:[%s1121_s2] ss:$0 sm:$0xff] (!%p166_p9)  ;;  %s189_s6 = scalar_lea.vmem (!%p166_p9), [#allocation2], %s188_s28  ;;  %s575_s11 = scalar_lea.sflag (!%p166_p9), [#allocation3], %s188_s28 }
  0x12   : > { %v771_v29 = vpack.c.bf16 (!%p166_p9), %v498_v28, %v497_v27  ;;  %s587_s7 = sshll.u32 (!%p166_p9), %s189_s6, 4  ;;  %s1079_s7 = int_to_ptr.vmem [resolvable:$true] %s587_s7 }
  0x13   : > { %701 = vmatpush3.bf16.msra.mxu0 (!%p166_p9), %v826_v2  ;;  %778 = vmatpush3.bf16.msra.mxu1 (!%p166_p9), %v826_v2  ;;  %s838_s12 = scalar_lea.vmem (!%p166_p9), %s1079_s7, 16 }
  0x14   : > { %702 = vmatprep.subr.bf16.mxu0 (!%p166_p9), %v902_v1  ;;  %775 = vmatprep.subr.bf16.mxu1 (!%p166_p9), %v902_v1  ;;  %p839_p11 = scmp.ne.s32.totalorder (!%p166_p9), %s1079_s7, %s838_s12 }
  0x15   : > { %s191_s9 = scalar_select %p190_p10, %s953_s19, 1 }
  0x16   : > { %p840_p12 = pnand %p839_p11, %p970_p5  ;;  %s906_s19 = smov [#allocation2]  }
  0x17   : > { %s781_s10 = smul.u32 72, %s191_s9  ;;  %703 = vmatpush3.bf16.msra.mxu0 %v827_v3  ;;  %779 = vmatpush3.bf16.msra.mxu1 %v827_v3 }
  0x18   : > { %704 = vmatprep.subr.bf16.mxu0 %v902_v1  ;;  %776 = vmatprep.subr.bf16.mxu1 %v902_v1  ;;  %p841_p13 = pneg %p840_p12 }
  0x19   : > { %s194_s13 = scalar_lea.vmem %s1119_s0, %s781_s10  ;;  %s1077_s10 = scalar_lea.hbm %s1123_s4, %s673_s5 }
  0x1a   : > { %v829_v8 = vld [vmem:[%s194_s13] sm:$0xff]   ;;  %v830_v9 = vld [vmem:[%s194_s13 + $0x28] sm:$0xff]   ;;  %v832_v11 = vld [vmem:[%s194_s13 + $0x30] sm:$0xff]  }
  0x1b   : > { %705 = vmatpush3.bf16.msra.mxu0 %v324_v7  ;;  %780 = vmatpush3.bf16.msra.mxu1 %v324_v7  ;;  %v831_v10 = vld [vmem:[%s194_s13 + $0x8] sm:$0xff]   ;;  %v833_v12 = vld [vmem:[%s194_s13 + $0x10] sm:$0xff]   ;;  %v834_v13 = vld [vmem:[%s194_s13 + $0x38] sm:$0xff]  }
  0x1c   : > { %v835_v14 = vld [vmem:[%s194_s13 + $0x18] sm:$0xff]   ;;  %v837_v15 = vld [vmem:[%s194_s13 + $0x40] sm:$0xff]   ;;  %761 = vmatprep.subr.bf16.mxu1 %v905_v19 }
  0x1d   : > { %v836_v16 = vld [vmem:[%s194_s13 + $0x20] sm:$0xff]   ;;  %s842_s13 = sshll.u32 %s906_s19, 4  ;;  %s843_s13 = int_to_ptr.vmem [resolvable:$false] %s842_s13 }
  0x1e   : > { %707 = vmatmul.mubr.msk.bf16.vlgmr.msra.gmra.mrb[0].mxu0 %vm292_vm2, %v829_v8  ;;  %727 = vmatmul.mubr.msk.bf16.vlgmr.msra.gmra.mrb[0].mxu1 %vm292_vm2, %v830_v9  ;;  %s844_s14 = scalar_lea.vmem %s843_s13, 32  ;;  %p845_p0 = scmp.lt.s32.totalorder %s1079_s7, %s843_s13 }
  0x1f   : > { %710 = vmatprep.mubr.msk.bf16.mxu0 %vm903_vm1, %v902_v1  ;;  %730 = vmatprep.mubr.msk.bf16.mxu1 %vm903_vm1, %v902_v1  ;;  %p846_p1 = scmp.lt.s32.totalorder %s844_s14, %s838_s12 }
  0x20   : > { %763 = vmatpush3.bf16.msra.mxu1 %v762_v20 }
  0x21   : > { %764 = vmatprep.subr.bf16.mxu1 %v905_v19  ;;  %p847_p2 = por %p846_p1, %p845_p0 }
  0x23   : > { %p848_p3 = pnand %p847_p2, %p841_p13 }
  0x24   : > { %766 = vmatpush3.bf16.msra.mxu1 %v765_v23 }
  0x25   : > { %767 = vmatprep.subr.bf16.mxu1 %v905_v19 }
  0x26   : > { %711 = vmatmul.mubr.msk.bf16.gmra.mrb[4].mxu0 %vm292_vm2, %v831_v10  ;;  %731 = vmatmul.mubr.msk.bf16.gmra.mrb[4].mxu1 %vm292_vm2, %v832_v11 }
  0x27   : > { %714 = vmatprep.mubr.msk.bf16.mxu0 %vm903_vm1, %v902_v1  ;;  %734 = vmatprep.mubr.msk.bf16.mxu1 %vm903_vm1, %v902_v1 }
  0x28   : > { %769 = vmatpush3.bf16.msra.mxu1 %v768_v26 }
  0x29   : > { %770 = vmatprep.subr.bf16.mxu1 %v905_v19 }
  0x2c   : > { %772 = vmatpush3.bf16.msra.mxu1 %v771_v29 }
  0x2e   : > { %715 = vmatmul.mubr.msk.bf16.gmra.mrb[8].mxu0 %vm292_vm2, %v833_v12  ;;  %735 = vmatmul.mubr.msk.bf16.gmra.mrb[8].mxu1 %vm292_vm2, %v834_v13 }
  0x2f   : > { %718 = vmatprep.mubr.msk.bf16.mxu0 %vm903_vm1, %v902_v1  ;;  %738 = vmatprep.mubr.msk.bf16.mxu1 %vm903_vm1, %v902_v1 }
  0x36   : > { %719 = vmatmul.mubr.msk.bf16.gmra.mrb[12].mxu0 %vm292_vm2, %v835_v14  ;;  %739 = vmatmul.mubr.msk.bf16.gmra.mrb[12].mxu1 %vm292_vm2, %v837_v15 }
  0x37   : > { %722 = vmatprep.mubr.msk.bf16.mxu0 %vm903_vm1, %v902_v1  ;;  %758 = vmatprep.mubr.msk.f32.mxu1 %vm903_vm1, %v902_v1 }
  0x3e   : > { %723 = vmatmul.mubr.msk.bf16.gmra.mrb[16].mxu0 %vm292_vm2, %v836_v16 }
  0xf1   : > { %v360_v30 = vpop.f32.mrb[0].mxu0  ;;  %v400_v31 = vpop.f32.mrb[0].mxu1 }
  0xf2   : > { %v708_v32 = vpop.f32.mrb[1].mxu0  ;;  %v728_v33 = vpop.f32.mrb[1].mxu1  ;;  %v361_v39 = vadd.f32 %v1043_v38, %v360_v30  ;;  %v401_v28 = vadd.f32 %v1043_v38, %v400_v31 }
  0xf3   : > { %v363_v34 = vpop.f32.mrb[2].mxu0  ;;  %v403_v35 = vpop.f32.mrb[2].mxu1 }
  0xf4   : > { %v709_v36 = vpop.f32.mrb[3].mxu0  ;;  %v729_v37 = vpop.f32.mrb[3].mxu1  ;;  %v364_v42 = vadd.f32 %v1043_v38, %v363_v34  ;;  %v431_v48 = vmax.f32 %v361_v39, 0.0  ;;  %v404_v33 = vadd.f32 %v1043_v38, %v403_v35 }
  0xf6   : > { %v432_v53 = vmax.f32 %v364_v42, 0.0 }
  0xf9   : > { %v368_v40 = vpop.f32.mrb[4].mxu0  ;;  %v408_v41 = vpop.f32.mrb[4].mxu1 }
  0xfa   : > { %v369_v43 = vadd.f32 %v1043_v38, %v368_v40  ;;  %v712_v44 = vpop.f32.mrb[5].mxu0  ;;  %v732_v45 = vpop.f32.mrb[5].mxu1  ;;  %v409_v56 = vadd.f32 %v1043_v38, %v408_v41  ;;  %v441_v40 = vmax.f32 %v401_v28, 0.0 }
  0xfb   : > { %v371_v46 = vpop.f32.mrb[6].mxu0  ;;  %v411_v47 = vpop.f32.mrb[6].mxu1  ;;  %v442_v45 = vmax.f32 %v404_v33, 0.0 }
  0xfc   : > { %v433_v49 = vmax.f32 %v369_v43, 0.0  ;;  %v372_v50 = vadd.f32 %v1043_v38, %v371_v46  ;;  %v713_v51 = vpop.f32.mrb[7].mxu0  ;;  %v733_v52 = vpop.f32.mrb[7].mxu1  ;;  %v412_v58 = vadd.f32 %v1043_v38, %v411_v47  ;;  %v443_v61 = vmax.f32 %v409_v56, 0.0  ;;  %v671_v56 = vld [vmem:[%s1121_s2 + $0x2] ss:$0 sm:$0xff] }
  0xfd   : > { %v670_v52 = vld [vmem:[%s1121_s2 + $0x1] ss:$0 sm:$0xff] }
  0xfe   : > { %v449_v54 = vmax.f32 %v431_v48, %v433_v49  ;;  %v434_v55 = vmax.f32 %v372_v50, 0.0  ;;  %v444_v3 = vmax.f32 %v412_v58, 0.0 }
 0x100   : > { %v450_v57 = vmax.f32 %v432_v53, %v434_v55 }
 0x101   : > { %v376_v59 = vpop.f32.mrb[8].mxu0  ;;  %v416_v60 = vpop.f32.mrb[8].mxu1 }
 0x102   : > { %v716_v62 = vpop.f32.mrb[9].mxu0  ;;  %v417_v63 = vadd.f32 %v1043_v38, %v416_v60  ;;  %v736_v0 = vpop.f32.mrb[9].mxu1  ;;  %v377_v10 = vadd.f32 %v1043_v38, %v376_v59 }
 0x103   : > { %v379_v1 = vpop.f32.mrb[10].mxu0  ;;  %v419_v2 = vpop.f32.mrb[10].mxu1 }
 0x104   : > { %v717_v4 = vpop.f32.mrb[11].mxu0  ;;  %v445_v5 = vmax.f32 %v417_v63, 0.0  ;;  %v420_v6 = vadd.f32 %v1043_v38, %v419_v2  ;;  %v737_v7 = vpop.f32.mrb[11].mxu1  ;;  %v380_v14 = vadd.f32 %v1043_v38, %v379_v1  ;;  %v435_v20 = vmax.f32 %v377_v10, 0.0 }
 0x106   : > { %v455_v8 = vmax.f32 %v443_v61, %v445_v5  ;;  %v446_v9 = vmax.f32 %v420_v6, 0.0  ;;  %v436_v25 = vmax.f32 %v380_v14, 0.0 }
 0x108   : > { %v456_v11 = vmax.f32 %v444_v3, %v446_v9 }
 0x109   : > { %v384_v12 = vpop.f32.mrb[12].mxu0  ;;  %v424_v13 = vpop.f32.mrb[12].mxu1 }
 0x10a   : > { %v385_v15 = vadd.f32 %v1043_v38, %v384_v12  ;;  %v720_v16 = vpop.f32.mrb[13].mxu0  ;;  %v740_v17 = vpop.f32.mrb[13].mxu1  ;;  %v425_v44 = vadd.f32 %v1043_v38, %v424_v13 }
 0x10b   : > { %v387_v18 = vpop.f32.mrb[14].mxu0  ;;  %v427_v19 = vpop.f32.mrb[14].mxu1 }
 0x10c   : > { %v437_v21 = vmax.f32 %v385_v15, 0.0  ;;  %v388_v22 = vadd.f32 %v1043_v38, %v387_v18  ;;  %v721_v23 = vpop.f32.mrb[15].mxu0  ;;  %v741_v24 = vpop.f32.mrb[15].mxu1  ;;  %v447_v49 = vmax.f32 %v425_v44, 0.0  ;;  %v428_v35 = vadd.f32 %v1043_v38, %v427_v19 }
 0x10e   : > { %v451_v26 = vmax.f32 %v435_v20, %v437_v21  ;;  %v438_v27 = vmax.f32 %v388_v22, 0.0 }
 0x110   : > { %v457_v29 = vmax.f32 %v449_v54, %v451_v26  ;;  %v452_v30 = vmax.f32 %v436_v25, %v438_v27  ;;  %v448_v54 = vmax.f32 %v428_v35, 0.0 }
 0x111   : > { %v392_v32 = vpop.f32.mrb[16].mxu0 }
 0x112   : > { %v458_v34 = vmax.f32 %v450_v57, %v452_v30  ;;  %v393_v36 = vadd.f32 %v1043_v38, %v392_v32  ;;  %v724_v37 = vpop.f32.mrb[17].mxu0 }
 0x113   : > { %v395_v39 = vpop.f32.mrb[18].mxu0 }
 0x114   : > { %v439_v41 = vmax.f32 %v393_v36, 0.0  ;;  %v396_v42 = vadd.f32 %v1043_v38, %v395_v39  ;;  %v725_v43 = vpop.f32.mrb[19].mxu0 }
 0x116   : > { %v453_v46 = vmax.f32 %v439_v41, %v441_v40  ;;  %v440_v31 = vmax.f32 %v396_v42, 0.0 }
 0x118   : > { %v459_v47 = vmax.f32 %v453_v46, %v455_v8  ;;  %v454_v48 = vmax.f32 %v440_v31, %v442_v45  ;;  %v499_v8 = vld [vmem:[%s1121_s2 + $0x3] sm:$0x1] }
 0x11a   : > { %v460_v50 = vmax.f32 %v454_v48, %v456_v11  ;;  %v461_v51 = vmax.f32 %v457_v29, %v459_v47 }
 0x11c   : > { %v463_v53 = vmax.f32 %v461_v51, %v447_v49  ;;  %v462_v55 = vmax.f32 %v458_v34, %v460_v50 }
 0x11e   : > { %v470_v57 = vmul.f32 %v670_v52, %v463_v53  ;;  %v464_v58 = vmax.f32 %v462_v55, %v448_v54 }
 0x120   : > { %v477_v59 = vadd.f32 %v671_v56, %v470_v57  ;;  %v471_v60 = vmul.f32 %v670_v52, %v464_v58 }
 0x122   : > { %v479_v61 = vmax.f32 %v477_v59, 0.0  ;;  %v478_v38 = vadd.f32 %v671_v56, %v471_v60 }
 0x124   : > { %v480_v62 = vmax.f32 %v478_v38, 0.0  ;;  %v482_v63 = vsel %vm481_vm3, %v479_v61, 0.0 }
 0x126   : > { %v483_v0 = vsel %vm481_vm3, %v480_v62, 0.0 }
 0x127   : > { %v484_v1 = vadd.f32 %v483_v0, %v482_v63 }
 0x129   : > { %v485_v2 = vrot.slane %v484_v1, 4 }
 0x12b   : > { %v486_v3 = vadd.f32 %v485_v2, %v484_v1 }
 0x12d   : > { %v487_v4 = vrot.slane %v486_v3, 2 }
 0x12f   : > { %v488_v5 = vadd.f32 %v487_v4, %v486_v3 }
 0x131   : > { %v489_v6 = vrot.slane %v488_v5, 1 }
 0x133   : > { %v490_v7 = vadd.f32 %v489_v6, %v488_v5 }
 0x135   : > { %759 = vmatmul.mubr.msk.f32.vlgmr.msra.gmra.mrb[16].mxu1 %vm481_vm3, %v490_v7 }
 0x208   : > { %v569_v9 = vpop.f32.mrb[16].mxu1 }
 0x209   : > { %v570_v10 = vadd.f32 %v569_v9, %v499_v8  ;;  %v760_v11 = vpop.f32.mrb[17].mxu1 }
 0x20b   : > { %573 = vst [vmem:[%s189_s6] sm:$0x1] %v570_v10 }
 0x20c   : > { %851 = shalt.err (!%p848_p3)
}
 0x20d   : > { %s852_s20 = scalar_lea.hbm %s1077_s10, 16  ;;  %s856_s27 = scalar_lea.hbm %s1123_s4, 32 }
 0x20e   : > { %p853_p4 = scmp.ne.s32.totalorder %s1077_s10, %s852_s20  ;;  %p857_p9 = scmp.lt.u32.totalorder %s1077_s10, %s1123_s4 }
 0x20f   : > { %p858_p10 = scmp.lt.u32.totalorder %s856_s27, %s852_s20  ;;  %p860_p12 = scmp.lt.u32.totalorder %s852_s20, %s1077_s10 }
 0x210   : > { %p854_p7 = pnand %p853_p4, %p970_p5 }
 0x211   : > { %p859_p11 = por %p858_p10, %p857_p9 }
 0x212   : > { %p855_p8 = pneg %p854_p7 }
 0x213   : > { %p861_p13 = por %p860_p12, %p859_p11 }
 0x215   : > { %p862_p0 = pnand %p861_p13, %p855_p8 }
 0x217   : > { %865 = shalt.err (!%p862_p0)
}
 0x218   : > { %782 = dma.vmem_to_hbm [thread:$0]  (%p970_p5), %s1079_s7, 16, %s1077_s10, %s575_s11  }
 0x219 PF: > { %p788_p1 = scmp.ge.s32.totalorder %s900_s18, 2  ;;  %s599_s30 = sand.u32 1, %s888_s15  }
 0x21a   : > { %s600_s5 = scalar_lea.sflag [#allocation3], %s599_s30 }
 0x21b   : > { %p785_p2 = pnand %p788_p1, %p974_p6 }
 0x21d   : > { %883 = dma.done.wait (!%p785_p2), %s600_s5, 16  }
 0x21e   : > { %885 = vsyncadd (!%p785_p2), %s600_s5, 4294967280  ;;  %p14_p3 = scmp.ge.s32.totalorder %s957_s21, 4   ;;  %s1126_s15 = smov %s892_s16 }
 0x21f   : > { %s1127_s16 = smov %s896_s17  ;;  %s1128_s17 = smov %s968_s24 }
 0x220   : > { %s1129_s18 = smov %s957_s21  ;;  %16 = sbr.rel (!%p14_p3) target bundleno = 3 (0x3), region = 71 }
 0x227   :  { %604 = vsyncpa [#allocation3], 1 }
 0x228   :  { %606 = vsyncpa [#allocation3 + $0x1], 1 }

</bundles_post_ra>
